<compile_context>
chip_gen: v6e
topology: v6e:2x2x1
jax: 0.10.0
libtpu: 0.0.40
codegen_flags: <defaults>
</compile_context>

<pallas_src>
import functools

import jax
import jax.numpy as jnp
from jax import lax
from jax.experimental import pallas as pl
from jax.experimental.pallas import tpu as pltpu


_LANE = 128
_SUBLANE = 8
_MAX_TILE_B = 16384  # double-buffered lane-padded p + temporaries stays < ~32 MiB


def _round_up(x, n):
    return ((x + n - 1) // n) * n


def _dissipated_energy_kernel(p_ref, m_ref, wt_ref, f_ref):
    p = p_ref[...]          # (tile_b, p_dim)   momenta tile
    m = m_ref[...]          # (1, tile_b)       lane-major masses
    w_t = wt_ref[...]       # (h_dim, p_dim)    VMEM-resident transposed weight

    # pw^T = W @ p^T -> (h_dim, tile_b).  NT contraction on the shared last
    # axis of both operands: lowers to an MXU matmul with no explicit XLU
    # transpose/relayout of the big (tile_b, p_dim) operand (checked via
    # pl.lower_as_mlir on the Mosaic dump).
    pw_t = lax.dot_general(
        w_t, p,
        dimension_numbers=(((1,), (1,)), ((), ())),
        preferred_element_type=jnp.float32,
    )

    # Numerically stable softplus: max(x, 0) + log1p(exp(-|x|)).
    sp = jnp.maximum(pw_t, 0.0) + jnp.log1p(jnp.exp(-jnp.abs(pw_t)))
    # TODO(synk): nn.Dropout with p>0 in training mode is not implemented;
    # module default dropout=0.0 is the identity (asserted in the wrapper).

    # Square + per-element NaN guard on the (h_dim, tile_b) slab, reduce over
    # h_dim (sublane axis).  alpha2 is hoisted to the reduced (1, tile_b) row
    # with a second NaN guard -> matches the torch per-element semantics,
    # including the m=0 / m=inf / m=nan corner cases.
    sp2 = sp * sp
    sp2 = jnp.where(jnp.isnan(sp2), 0.0, sp2)
    row = jnp.sum(sp2, axis=0, keepdims=True)            # (1, tile_b)

    m32 = m.astype(jnp.float32)
    alpha2 = 1.0 / (m32 * m32)                            # exact; row-only, negligible
    f = alpha2 * row
    f_ref[...] = jnp.where(jnp.isnan(f), 0.0, f)


def _choose_tile(B, tile_b):
    """Lane-dense, VMEM-safe batch tile; >= 2 grid steps whenever B > one lane."""
    if B <= _LANE:
        # Tiny batch: a single full block rounded to the sublane quantum.
        return _round_up(B, _SUBLANE)
    tile_b = max(_LANE, min(_round_up(tile_b, _LANE), _MAX_TILE_B))
    # Guarantee at least 2 grid steps so the "parallel" axis shards across
    # both TensorCores on v7x and the DMA pipeline stays busy.
    return min(tile_b, _round_up(pl.cdiv(B, 2), _LANE))


@functools.partial(jax.jit, static_argnames=("tile_b", "dropout"))
def dissipated_energy(p, m, w, *, tile_b=8192, dropout=0.0):
    """p: (B, p_dim), m: (B, 1), w: (p_dim, h_dim)  ->  f: (B, 1) float32."""
    assert dropout == 0.0, "TODO(synk): dropout>0 (training mode) not implemented"
    B, p_dim = p.shape
    h_dim = w.shape[1]
    assert w.shape == (p_dim, h_dim)
    assert m.shape == (B, 1)

    tile_b = _choose_tile(B, tile_b)
    Bp = _round_up(B, tile_b)
    num_tiles = Bp // tile_b

    # Pad batch to whole tiles (pad masses with 1.0 so padded lanes stay
    # finite; they are sliced off below).
    if Bp != B:
        p = jnp.pad(p, ((0, Bp - B), (0, 0)))
        m = jnp.pad(m, ((0, Bp - B), (0, 0)), constant_values=1.0)

    m_lane = m.reshape(1, Bp)     # (B,1) -> (1,B): contiguous relabel, no transpose
    w_t = w.T                     # (h_dim, p_dim): tiny, done once in the wrapper

    # Explicit VMEM budget: the (tile_b, p_dim) block is lane-padded to 128
    # lanes and double-buffered by the pipeline; add the lane-major rows, the
    # resident weight, a few (h_dim, tile_b) f32 temporaries and headroom.
    tile_lanes = _round_up(tile_b, _LANE)
    pdim_pad = _round_up(p_dim, _LANE)
    hdim_pad = _round_up(h_dim, _SUBLANE)
    vmem_bytes = (
        2 * tile_b * pdim_pad * p.dtype.itemsize          # p: double-buffered, lane-padded
        + 2 * _SUBLANE * tile_lanes * m.dtype.itemsize    # masses rows (sublane-padded)
        + 2 * _SUBLANE * tile_lanes * 4                   # output rows
        + 2 * hdim_pad * pdim_pad * w.dtype.itemsize      # resident weight
        + 6 * hdim_pad * tile_lanes * 4                   # slab temporaries (pw, sp, sp2, ...)
        + (2 << 20)                                       # headroom
    )
    vmem_limit = int(min(max(vmem_bytes, 16 << 20), 48 << 20))

    cost = pl.CostEstimate(
        flops=2 * Bp * p_dim * h_dim,
        transcendentals=2 * Bp * h_dim,
        bytes_accessed=(p.dtype.itemsize * Bp * p_dim
                        + w.dtype.itemsize * p_dim * h_dim
                        + m.dtype.itemsize * Bp
                        + 4 * Bp),
    )

    out = pl.pallas_call(
        _dissipated_energy_kernel,
        out_shape=jax.ShapeDtypeStruct((1, Bp), jnp.float32),
        grid=(num_tiles,),
        in_specs=[
            pl.BlockSpec((tile_b, p_dim), lambda i: (i, 0)),    # p tile
            pl.BlockSpec((1, tile_b), lambda i: (0, i)),        # masses, lane-major
            pl.BlockSpec((h_dim, p_dim), lambda i: (0, 0)),     # weight, VMEM-resident
        ],
        out_specs=pl.BlockSpec((1, tile_b), lambda i: (0, i)),  # lane-dense slab
        compiler_params=pltpu.CompilerParams(
            dimension_semantics=("parallel",),
            vmem_limit_bytes=vmem_limit,
        ),
        cost_estimate=cost,
    )(p, m_lane, w_t)

    return out[0, :B].reshape(B, 1)


def _reference(p, m, w):
    pw = p.astype(jnp.float32) @ w.astype(jnp.float32)
    sp = jnp.logaddexp(pw, 0.0)
    a2 = 1.0 / (m.astype(jnp.float32) ** 2)
    a = a2 * sp * sp
    a = jnp.where(jnp.isnan(a), 0.0, a)
    return jnp.sum(a, axis=1, keepdims=True)


if __name__ == "__main__":
    key = jax.random.PRNGKey(0)
    kp, km, kw, kp2, km2 = jax.random.split(key, 5)

    # Small shapes consistent with the module (p_dim=32, h_dim=16).
    B, p_dim, h_dim = 8, 32, 16
    p = jax.random.normal(kp, (B, p_dim), dtype=jnp.float32)
    m = jax.random.uniform(km, (B, 1), dtype=jnp.float32, minval=0.5, maxval=2.0)
    bound = 1.0 / (p_dim ** 0.5)   # torch nn.Linear default init range
    w = jax.random.uniform(kw, (p_dim, h_dim), dtype=jnp.float32,
                           minval=-bound, maxval=bound)

    f = jax.block_until_ready(dissipated_energy(p, m, w))
    f_ref = _reference(p, m, w)
    assert f.shape == (B, 1)
    # Exact reciprocal now used for 1/m^2 -> tight tolerance.
    assert jnp.allclose(f, f_ref, rtol=1e-5, atol=1e-5), (f, f_ref)

    # Multi-tile / padded path with the default (large) tile request: B=300 ->
    # tile 256, 2 grid steps (exercises the >=2-step v7x logic and padding).
    B2 = 300
    p2 = jax.random.normal(kp2, (B2, p_dim), dtype=jnp.float32)
    m2 = jax.random.uniform(km2, (B2, 1), dtype=jnp.float32, minval=0.5, maxval=2.0)
    f2 = jax.block_until_ready(dissipated_energy(p2, m2, w))
    f2_ref = _reference(p2, m2, w)
    assert f2.shape == (B2, 1)
    assert jnp.allclose(f2, f2_ref, rtol=1e-5, atol=1e-5), (f2, f2_ref)

    print("KERNEL_OK")
</pallas_src>

<mosaic_0001>
module attributes {stable_mosaic.version = 11 : i64} {
  func.func @_dissipated_energy_kernel(%arg0: i32, %arg1: memref<8x32xf32, #tpu.memory_space<vmem>>, %arg2: memref<1x8xf32, #tpu.memory_space<vmem>>, %arg3: memref<16x32xf32, #tpu.memory_space<vmem>>, %arg4: memref<1x8xf32, #tpu.memory_space<vmem>>) attributes {dimension_semantics = [#tpu.dimension_semantics<parallel>], iteration_bounds = array<i64: 1>, scalar_prefetch = 0 : i64, scratch_operands = 0 : i64, tpu.core_type = #tpu.core_type<tc>, window_params = [{transform_indices = @transform_0, window_bounds = array<i64: 8, 32>}, {transform_indices = @transform_1, window_bounds = array<i64: 1, 8>}, {pipeline_mode = #tpu.pipeline_mode<synchronous>, transform_indices = @transform_2, window_bounds = array<i64: 16, 32>}, {transform_indices = @transform_3, window_bounds = array<i64: 1, 8>}]} {
    %c0 = arith.constant 0 : index
    %c0_0 = arith.constant 0 : index
    %0 = vector.load %arg1[%c0, %c0_0] : memref<8x32xf32, #tpu.memory_space<vmem>>, vector<8x32xf32>
    %c0_1 = arith.constant 0 : index
    %c0_2 = arith.constant 0 : index
    %1 = vector.load %arg2[%c0_1, %c0_2] : memref<1x8xf32, #tpu.memory_space<vmem>>, vector<1x8xf32>
    %c0_3 = arith.constant 0 : index
    %c0_4 = arith.constant 0 : index
    %2 = vector.load %arg3[%c0_3, %c0_4] : memref<16x32xf32, #tpu.memory_space<vmem>>, vector<16x32xf32>
    %cst = arith.constant dense<0.000000e+00> : vector<16x8xf32>
    %3 = tpu.matmul %2, %0, %cst {dimension_numbers = #tpu.dot_dimension_numbers<[1], [1], [0], [0], [0, 0, 1, 0], [], []>} : vector<16x32xf32>, vector<8x32xf32>, vector<16x8xf32> -> vector<16x8xf32>
    %cst_5 = arith.constant 0.000000e+00 : f32
    %4 = vector.broadcast %cst_5 : f32 to vector<16x8xf32>
    %5 = arith.maximumf %3, %4 : vector<16x8xf32>
    %6 = math.absf %3 : vector<16x8xf32>
    %cst_6 = arith.constant 0.000000e+00 : f32
    %7 = vector.broadcast %cst_6 : f32 to vector<16x8xf32>
    %8 = arith.subf %7, %6 : vector<16x8xf32>
    %9 = math.exp %8 : vector<16x8xf32>
    %10 = math.log1p %9 : vector<16x8xf32>
    %11 = arith.addf %5, %10 : vector<16x8xf32>
    %12 = arith.mulf %11, %11 : vector<16x8xf32>
    %13 = arith.cmpf one, %12, %12 : vector<16x8xf32>
    %cst_7 = arith.constant 0.000000e+00 : f32
    %14 = vector.broadcast %cst_7 : f32 to vector<16x8xf32>
    %15 = arith.select %13, %14, %12 : vector<16x8xi1>, vector<16x8xf32>
    %cst_8 = arith.constant dense<0.000000e+00> : vector<8xf32>
    %16 = vector.multi_reduction <add>, %15, %cst_8 [0] : vector<16x8xf32> to vector<8xf32>
    %17 = vector.shape_cast %16 : vector<8xf32> to vector<1x8xf32>
    %18 = arith.mulf %1, %1 : vector<1x8xf32>
    %cst_9 = arith.constant 1.000000e+00 : f32
    %19 = vector.broadcast %cst_9 : f32 to vector<1x8xf32>
    %20 = arith.divf %19, %18 : vector<1x8xf32>
    %21 = arith.mulf %20, %17 : vector<1x8xf32>
    %22 = arith.cmpf one, %21, %21 : vector<1x8xf32>
    %cst_10 = arith.constant 0.000000e+00 : f32
    %23 = vector.broadcast %cst_10 : f32 to vector<1x8xf32>
    %24 = arith.select %22, %23, %21 : vector<1x8xi1>, vector<1x8xf32>
    %c0_11 = arith.constant 0 : index
    %c0_12 = arith.constant 0 : index
    %25 = vector.load %arg4[%c0_11, %c0_12] : memref<1x8xf32, #tpu.memory_space<vmem>>, vector<1x8xf32>
    tpu.vector_store %arg4[%c0_11, %c0_12], %24 {strides = array<i32>} : memref<1x8xf32, #tpu.memory_space<vmem>>, vector<1x8xf32>,
    return
  }
  func.func @transform_0(%arg0: i32) -> (i32, i32) {
    %c0_i32 = arith.constant 0 : i32
    %c0_i32_0 = arith.constant 0 : i32
    return %arg0, %c0_i32 : i32, i32
  }
  func.func @transform_1(%arg0: i32) -> (i32, i32) {
    %c0_i32 = arith.constant 0 : i32
    %c0_i32_0 = arith.constant 0 : i32
    return %c0_i32, %arg0 : i32, i32
  }
  func.func @transform_2(%arg0: i32) -> (i32, i32) {
    %c0_i32 = arith.constant 0 : i32
    %c0_i32_0 = arith.constant 0 : i32
    %c0_i32_1 = arith.constant 0 : i32
    return %c0_i32, %c0_i32_0 : i32, i32
  }
  func.func @transform_3(%arg0: i32) -> (i32, i32) {
    %c0_i32 = arith.constant 0 : i32
    %c0_i32_0 = arith.constant 0 : i32
    return %c0_i32, %arg0 : i32, i32
  }
}

</mosaic_0001>

<bundles_post_ra>
// kernel: dissipated_energy.1
= control target key start
LH: loop header
LB: loop body
LE: loop exit
PB: predicated region body
PF: predicated region fallthrough
CT: control target
= control target key end

     0   :  { %8 = vsyncpa [#allocation3], 0  ;;  %s329_s0 = inlined_call_operand.hbm [shape: f32[8,32], index: 0, kind: input, shape index: {}]   ;;  %s330_s1 = inlined_call_operand.vmem [shape: f32[1,8], index: 1, kind: input, shape index: {}]   ;;  %s331_s2 = inlined_call_operand.hbm [shape: f32[16,32], index: 2, kind: input, shape index: {}]   ;;  %s332_s3 = inlined_call_operand.hbm [shape: f32[1,8], index: 3, kind: output, shape index: {}]  }
   0x1   :  { %9 = vsyncpa [#allocation6], 0 }
   0x2   :  { %10 = vsyncpa [#allocation4], 0  ;;  %s292_s12 = smov [#allocation2]   ;;  %s293_s14 = smov [#allocation5]  }
   0x3   :  { %s17_s13 = sshll.u32 %s292_s12, 4  ;;  %s28_s15 = sshll.u32 %s293_s14, 4  ;;  %s18_s13 = int_to_ptr.vmem [resolvable:$true] %s17_s13  ;;  %s29_s15 = int_to_ptr.vmem [resolvable:$true] %s28_s15 }
   0x4   :  { %s234_s16 = scalar_lea.vmem %s18_s13, 128  ;;  %p239_p1 = scmp.lt.s32.totalorder %s18_s13, %s18_s13 }
   0x5   :  { %p235_p0 = scmp.ne.s32.totalorder %s18_s13, %s234_s16  ;;  %p240_p2 = scmp.lt.s32.totalorder %s234_s16, %s234_s16 }
   0x7   :  { %p241_p3 = por %p240_p2, %p239_p1 }
   0x9   :  { %p242_p4 = pnand %p241_p3, %p235_p0 }
   0xb   :  { %245 = shalt.err (!%p242_p4)
}
   0xc   :  { %20 = dma.hbm_to_vmem [thread:$0]  %s329_s0, 128, %s18_s13, [#allocation3]  }
   0xd   :  { %s254_s19 = scalar_lea.vmem %s29_s15, 256  ;;  %p259_p6 = scmp.lt.s32.totalorder %s29_s15, %s29_s15 }
   0xe   :  { %p255_p5 = scmp.ne.s32.totalorder %s29_s15, %s254_s19  ;;  %p260_p7 = scmp.lt.s32.totalorder %s254_s19, %s254_s19 }
  0x10   :  { %p261_p8 = por %p260_p7, %p259_p6 }
  0x12   :  { %p262_p9 = pnand %p261_p8, %p255_p5 }
  0x14   :  { %265 = shalt.err (!%p262_p9)
}
  0x15   :  { %s294_s20 = smov 128   ;;  %s295_s21 = smov 8  }
  0x16   :  { %34 = dma.hbm_to_vmem [thread:$0]  %s331_s2, 256, %s29_s15, [#allocation6], %s294_s20, %s294_s20, %s295_s21  }
  0x17   :  { %286 = dma.done.wait [#allocation3], 128  }
  0x18   :  { %287 = vsyncadd [#allocation3], 4294967168 }
  0x19   :  { %288 = dma.done.wait [#allocation6], 256  }
  0x1a   :  { %289 = vsyncadd [#allocation6], 4294967040  ;;  %vm45_vm0 = vcmask 261120   ;;  %v41_v0 = vld [vmem:[#allocation2] sm:$0xff]  ;;  %v43_v1 = vld [vmem:[#allocation5] sm:$0xff]  ;;  %vm166_vm4 = vcmask 64512  }
  0x1b   :  { %206 = vmatprep.subr.msk.mxu0 %vm45_vm0, %v41_v0  ;;  %208 = vmatprep.mubr.msk.f32.mxu0 %vm45_vm0, %v43_v1  ;;  %v44_v2 = vld [vmem:[#allocation5 + $0x8] sm:$0xff]  ;;  %v42_v31 = vld [vmem:[%s330_s1] sm:$0x1]  ;;  %s296_s1 = smov [#allocation7]   ;;  %vm182_vm6 = vcmask 57344  }
  0x1c   :  { %207 = vmatpush3.xpose.msk.msra.mxu0 %vm45_vm0, %v41_v0  ;;  %v176_v35 = vmul.f32 %v42_v31, %v42_v31  ;;  %s190_s24 = sshll.u32 %s296_s1, 4  ;;  %s191_s24 = int_to_ptr.vmem [resolvable:$true] %s190_s24 }
  0x1d   :  { %s266_s25 = scalar_lea.vmem %s191_s24, 16  ;;  %s270_s26 = scalar_lea.vmem %s191_s24, 32 }
  0x1e   :  { %p267_p10 = scmp.ne.s32.totalorder %s191_s24, %s266_s25  ;;  %p271_p11 = scmp.lt.s32.totalorder %s191_s24, %s191_s24 }
  0x1f   :  { %209 = vmatmul.mubr.msk.f32.vlgmr.msra.gmra.mxu0 %vm45_vm0, %v44_v2  ;;  %p272_p12 = scmp.lt.s32.totalorder %s270_s26, %s266_s25 }
  0x21   :  { %p273_p13 = por %p272_p12, %p271_p11 }
  0x23   :  { %p274_p0 = pnand %p273_p13, %p267_p10 }
  0xdf   :  { %v210_v3 = vpop.f32.mrf.mxu0 }
  0xe0   :  { %v133_v4 = vand.u32 2147483647, %v210_v3  ;;  %v131_v25 = vmax.f32 %v210_v3, 0.0 }
  0xe1   :  { %v121_v5 = vpop.f32.mrf.mxu0 }
  0xe2   :  { %v135_v6 = vsub.f32 0.0, %v133_v4  ;;  %v132_v7 = vand.u32 2147483647, %v121_v5  ;;  %v130_v30 = vmax.f32 %v121_v5, 0.0 }
  0xe4   :  { %v138_v8 = vmul.f32 1.442695, %v135_v6  ;;  %v134_v9 = vsub.f32 0.0, %v132_v7 }
  0xe6   :  { %216 = vpow2.f32 %v138_v8  ;;  %v136_v10 = vmul.f32 1.442695, %v134_v9 }
  0xe8   :  { %218 = vpow2.f32 %v136_v10 }
  0xf3   :  { %v217_v11 = vpop.eup %216 }
  0xf4   :  { %v149_v12 = vadd.f32 1.0, %v217_v11  ;;  %v152_v15 = vmul.f32 -0.5, %v217_v11  ;;  %v155_v18 = vand.u32 2147483647, %v217_v11 }
  0xf5   :  { %v219_v13 = vpop.eup %218 }
  0xf6   :  { %220 = vlog2.f32 %v149_v12  ;;  %v140_v14 = vadd.f32 1.0, %v219_v13  ;;  %v143_v16 = vmul.f32 -0.5, %v219_v13  ;;  %v153_v17 = vadd.f32 1.0, %v152_v15 }
  0xf7   :  { %v146_v21 = vand.u32 2147483647, %v219_v13  ;;  %vm156_vm1 = vcmp.lt.f32.partialorder %v155_v18, 0.0004427343 }
  0xf8   :  { %222 = vlog2.f32 %v140_v14  ;;  %v144_v19 = vadd.f32 1.0, %v143_v16  ;;  %v154_v23 = vmul.f32 %v217_v11, %v153_v17 }
  0xf9   :  { %vm147_vm2 = vcmp.lt.f32.partialorder %v146_v21, 0.0004427343  ;;  %224 = vrcp.f32 %v176_v35 }
  0xfa   :  { %v145_v28 = vmul.f32 %v219_v13, %v144_v19 }
 0x103   :  { %v221_v20 = vpop.eup %220 }
 0x104   :  { %v151_v22 = vmul.f32 0.6931472, %v221_v20 }
 0x105   :  { %v223_v24 = vpop.eup %222 }
 0x106   :  { %v157_v26 = vsel %vm156_vm1, %v154_v23, %v151_v22  ;;  %v142_v27 = vmul.f32 0.6931472, %v223_v24  ;;  %v225_v47 = vpop.eup %224 }
 0x107   :  { %v159_v29 = vadd.f32 %v157_v26, %v131_v25 }
 0x108   :  { %v148_v32 = vsel %vm147_vm2, %v145_v28, %v142_v27 }
 0x109   :  { %v161_v33 = vmul.f32 %v159_v29, %v159_v29  ;;  %v158_v34 = vadd.f32 %v148_v32, %v130_v30 }
 0x10b   :  { %vm163_vm3 = vcmp.ne.f32.partialorder %v161_v33, %v161_v33  ;;  %v160_v36 = vmul.f32 %v158_v34, %v158_v34 }
 0x10c   :  { %v165_v37 = vsel %vm163_vm3, 0.0, %v161_v33 }
 0x10d   :  { %vm162_vm5 = vcmp.ne.f32.partialorder %v160_v36, %v160_v36  ;;  %v168_v40 = vsel %vm166_vm4, %v165_v37, 0.0 }
 0x10e   :  { %v164_v38 = vsel %vm162_vm5, 0.0, %v160_v36 }
 0x10f   :  { %v167_v39 = vsel %vm166_vm4, %v164_v38, 0.0 }
 0x110   :  { %v169_v41 = vadd.f32 %v168_v40, %v167_v39 }
 0x112   :  { %v170_v42 = vrot.slane %v169_v41, 4 }
 0x114   :  { %v171_v43 = vadd.f32 %v170_v42, %v169_v41 }
 0x116   :  { %v172_v44 = vrot.slane %v171_v43, 2 }
 0x118   :  { %v173_v45 = vadd.f32 %v172_v44, %v171_v43 }
 0x11a   :  { %v174_v46 = vrot.slane %v173_v45, 1 }
 0x11c   :  { %v175_v48 = vadd.f32 %v174_v46, %v173_v45 }
 0x11e   :  { %v179_v49 = vmul.f32 %v225_v47, %v175_v48 }
 0x120   :  { %vm180_vm7 = vcmp.ne.f32.partialorder %v179_v49, %v179_v49 }
 0x121   :  { %v181_v50 = vsel %vm180_vm7, 0.0, %v179_v49 }
 0x122   :  { %183 = vst.msk [vmem:[#allocation7] sm:$0x1] %vm182_vm6, %v181_v50 }
 0x123   :  { %277 = shalt.err (!%p274_p0)
}
 0x124   :  { %193 = dma.vmem_to_hbm [thread:$0]  %s191_s24, 16, %s332_s3, [#allocation4]  }
 0x125   :  { %290 = dma.done.wait [#allocation4], 16  }
 0x126   :  { %291 = vsyncadd [#allocation4], 4294967280 }
 0x127   :  { %197 = vsyncpa [#allocation3], 1 }
 0x128   :  { %198 = vsyncpa [#allocation6], 1 }
 0x129   :  { %199 = vsyncpa [#allocation4], 1 }

</bundles_post_ra>
